<compile_context>
chip_gen: v7x
topology: tpu7x:2x2x1
jax: 0.10.0
libtpu: 0.0.40
codegen_flags: <defaults>
</compile_context>

<pallas_src>
import math
import functools
import numpy as np

import jax
import jax.numpy as jnp
from jax.experimental import pallas as pl
from jax.experimental.pallas import tpu as pltpu


_CP1 = pltpu.CompilerParams(dimension_semantics=("arbitrary",),
                            vmem_limit_bytes=32 * 1024 * 1024)


def _fullspec(shape):
    idx = (0,) * len(shape)
    return pl.BlockSpec(shape, lambda *_: idx)


def _stackspec(shape):
    """BlockSpec selecting per-layer slice li of an (nL, *shape) stacked weight."""
    zeros = (0,) * len(shape)
    return pl.BlockSpec((None,) + tuple(shape), lambda li, _z=zeros: (li,) + _z)


def _ln_rows(x, g, b, eps):
    mu = jnp.mean(x, axis=-1, keepdims=True)
    var = jnp.mean(jnp.square(x - mu), axis=-1, keepdims=True)
    return (x - mu) * jax.lax.rsqrt(var + eps) * g + b


def _erf_approx(x):
    # Abramowitz & Stegun 7.1.26, |err| < 1.5e-7 (exact-erf GELU of nn.GELU()).
    a1, a2, a3, a4, a5 = 0.254829592, -0.284496736, 1.421413741, -1.453152027, 1.061405429
    p = 0.3275911
    s = jnp.sign(x)
    ax = jnp.abs(x)
    t = pl.reciprocal(1.0 + p * ax)          # exact reciprocal (EUP slot), keeps error bound
    poly = ((((a5 * t + a4) * t + a3) * t + a2) * t + a1) * t
    return s * (1.0 - poly * jnp.exp(-ax * ax))


# ---------------------------------------------------------------------------
# Pallas kernels
# ---------------------------------------------------------------------------

def _liw_kernel(iw_ref, fcw_ref, fcb_ref, ow_ref, ob_ref, gw_ref, w_ref, kld_ref):
    """LearnableImportanceWeights: relu(fc(x)) -> out -> softmax, plus KL(softmax || gw)."""
    f32 = jnp.float32
    h = jnp.maximum(jnp.dot(iw_ref[...], fcw_ref[...], preferred_element_type=f32)
                    + fcb_ref[...], 0.0)
    z = jnp.dot(h, ow_ref[...], preferred_element_type=f32) + ob_ref[...]
    m = jnp.max(z, axis=-1, keepdims=True)
    e = jnp.exp(z - m)
    ssum = jnp.sum(e, axis=-1, keepdims=True)
    w_ref[...] = e * pl.reciprocal(ssum)                  # exact reciprocal (EUP)
    gw = gw_ref[...]
    logp = (z - m) - jnp.log(ssum)                        # stable log-softmax
    # F.kl_div(log_p, gw, 'sum') with xlogy semantics (0*log0 = 0) -> NaN-safe.
    kl = jnp.where(gw > 0.0, gw * (jnp.log(jnp.maximum(gw, 1e-30)) - logp), 0.0)
    kld_ref[...] = jnp.sum(kl, axis=-1, keepdims=True)


def _embed_kernel(gap_ref, bw_ref, bb_ref, grid_ref, cw_ref, cb_ref, pb_ref, pos_ref,
                  *rest, B, P, Lf, nL, groups):
    """Backbone stand-in + CLS stand-in + patch embeddings + pos-enc, written directly
    into the fixed-length (B*Lf, E) sequence buffer (ximg rows [0,nL), cls row nL,
    patch tokens rows [nL+1, Lf) per image)."""
    f32 = jnp.float32
    bf16 = jnp.bfloat16
    n_groups = len(groups)
    seq_ref = rest[2 * n_groups]

    # TODO(synk): backbone is an external nn.Module argument; stand-in = GAP + Linear(C->E).
    ximg = jnp.dot(gap_ref[...].astype(bf16), bw_ref[...],
                   preferred_element_type=f32) + bb_ref[...]                 # (B, E)
    # TODO(synk): CLSToken2 is not defined in the source file; stand-in =
    # patch conv over the full ps-grid + global average pool.
    cls_all = jnp.dot(grid_ref[...].astype(bf16), cw_ref[...],
                      preferred_element_type=f32) + cb_ref[...]              # (B*P, E)
    pb = pb_ref[...]
    pos = pos_ref[...]                                                       # (T, E)
    E = ximg.shape[1]

    for b in range(B):
        base = b * Lf
        # nL (not-yet-processed) ximg copies at their final row positions, written up front.
        seq_ref[base:base + nL, :] = jnp.broadcast_to(ximg[b:b + 1, :], (nL, E))
        # CLS token row (cls_posenc = zeros, so no pos add).
        seq_ref[base + nL:base + nL + 1, :] = jnp.mean(
            cls_all[b * P:(b + 1) * P, :], axis=0, keepdims=True)

    for g in range(n_groups):
        cnt, runs = groups[g]
        pix = rest[2 * g][...]                                              # (B*cnt, Kg)
        wg = rest[2 * g + 1][...]                                           # (Kg, E)
        emb = jnp.dot(pix.astype(bf16), wg, preferred_element_type=f32) + pb
        for b in range(B):
            for (gstart, rlen, tstart) in runs:                             # contiguous runs
                src = (emb[b * cnt + gstart:b * cnt + gstart + rlen, :]
                       + pos[tstart:tstart + rlen, :])
                dst0 = b * Lf + nL + 1 + tstart
                seq_ref[dst0:dst0 + rlen, :] = src


def _layers_kernel(lpos_ref, seq0_ref, win_ref, bin_ref, wo_ref, bo_ref,
                   g1_ref, be1_ref, g2_ref, be2_ref, w1_ref, b1_ref, w2_ref, b2_ref,
                   fing_ref, finb_ref, o_ref, scr_ref, *, B, Lf, E, H, nL, eps=1e-5):
    """All nL post-norm TransformerEncoderLayers in one grid'ed call (grid axis = layer).

    The sequence buffer (B*Lf, E) lives in the VMEM scratch across grid steps.  Attention
    runs over the B axis (batch_first=False convention); the token axis is the attention
    batch, so rows below the active threshold can be processed and simply not committed.
    The final nn.LayerNorm is fused into the last grid step.
    """
    f32 = jnp.float32
    bf16 = jnp.bfloat16
    hd = E // H
    scale = 1.0 / math.sqrt(hd)
    li = pl.program_id(0)

    @pl.when(li == 0)
    def _():
        scr_ref[...] = seq0_ref[...]

    x = scr_ref[...]                                                        # (B*Lf, E) f32
    xb = x.astype(bf16)

    # Fused q/k/v projection over the whole slab: one (B*Lf, E) x (E, 3E) matmul.
    qkv = jnp.dot(xb, win_ref[...], preferred_element_type=f32) + bin_ref[...]
    q = qkv[:, :E]
    k = qkv[:, E:2 * E]
    v = qkv[:, 2 * E:]
    qs = [q[s * Lf:(s + 1) * Lf, :] for s in range(B)]
    ks = [k[s * Lf:(s + 1) * Lf, :] for s in range(B)]
    vs = [v[s * Lf:(s + 1) * Lf, :] for s in range(B)]

    # Multi-head attention over the B axis; per-head scores via lane-slice reductions
    # (VPU/XLU), no selector matmuls on the MXU.
    attn_rows = []
    for s in range(B):
        qk = [qs[s] * ks[t] for t in range(B)]                              # (Lf, E) each
        head_outs = []
        for h in range(H):
            lo, hi = h * hd, (h + 1) * hd
            scores = [jnp.sum(qk[t][:, lo:hi], axis=-1, keepdims=True) * scale
                      for t in range(B)]                                    # (Lf, 1) each
            m = scores[0]
            for t in range(1, B):
                m = jnp.maximum(m, scores[t])
            exps = [jnp.exp(sc - m) for sc in scores]
            den = exps[0]
            for t in range(1, B):
                den = den + exps[t]
            inv = pl.reciprocal(den, approx=True)                           # EUP; den >= 1
            out_h = (exps[0] * inv) * vs[0][:, lo:hi]
            for t in range(1, B):
                out_h = out_h + (exps[t] * inv) * vs[t][:, lo:hi]
            head_outs.append(out_h)                                         # (Lf, hd)
        attn_rows.append(jnp.concatenate(head_outs, axis=-1))               # (Lf, E)
    attn = jnp.concatenate(attn_rows, axis=0)                               # (B*Lf, E)

    ao = jnp.dot(attn.astype(bf16), wo_ref[...], preferred_element_type=f32) + bo_ref[...]
    x1 = x + ao                                                             # dropout = id
    xn = _ln_rows(x1, g1_ref[...], be1_ref[...], eps)
    hmid = jnp.maximum(jnp.dot(xn.astype(bf16), w1_ref[...],
                               preferred_element_type=f32) + b1_ref[...], 0.0)
    ff = jnp.dot(hmid.astype(bf16), w2_ref[...], preferred_element_type=f32) + b2_ref[...]
    y = _ln_rows(xn + ff, g2_ref[...], be2_ref[...], eps)

    # Only rows l >= nL - li are part of this layer's sequence; rows below keep the fresh
    # (unprocessed) ximg copies written by the embed kernel -> exact prepend semantics.
    keep = lpos_ref[...] < (nL - li)
    seq_new = jnp.where(keep, x, y)
    scr_ref[...] = seq_new

    @pl.when(li == nL - 1)
    def _():
        o_ref[...] = _ln_rows(seq_new, fing_ref[...], finb_ref[...], eps)   # final LayerNorm


def _head_kernel(x_ref, dw_ref, db_ref, hw_ref, hb_ref, o_ref):
    """Flattened DynamicLinear (single K = Lf*E contraction) + exact-erf GELU + classifier."""
    f32 = jnp.float32
    bf16 = jnp.bfloat16
    y = jnp.dot(x_ref[...].astype(bf16), dw_ref[...], preferred_element_type=f32) + db_ref[...]
    y = 0.5 * y * (1.0 + _erf_approx(y * (1.0 / math.sqrt(2.0))))           # exact GELU
    o_ref[...] = jnp.dot(y.astype(bf16), hw_ref[...],
                         preferred_element_type=f32) + hb_ref[...]          # final dropout: id


# ---------------------------------------------------------------------------
# pallas_call wrappers
# ---------------------------------------------------------------------------

def pallas_liw(iw, gw, fcw_t, fcb, ow_t, ob):
    P = iw.shape[1]
    ins = [iw, fcw_t, fcb, ow_t, ob, gw]
    return pl.pallas_call(
        _liw_kernel,
        out_shape=(jax.ShapeDtypeStruct((1, P), jnp.float32),
                   jax.ShapeDtypeStruct((1, 1), jnp.float32)),
        grid=(1,),
        in_specs=[_fullspec(a.shape) for a in ins],
        out_specs=(_fullspec((1, P)), _fullspec((1, 1))),
        compiler_params=_CP1,
    )(*ins)


def pallas_embed(gap, grid16, group_mats, packed, plan, cfg, B, Lf):
    E = cfg["embed_dim"]
    P = cfg["num_patches"]
    nL = cfg["num_layers"]
    ins = [gap, packed["backbone_wt"], packed["backbone_b"], grid16,
           packed["cls_wt"], packed["cls_b"], packed["patch_b"], packed["pos_embed"]]
    for gm, gw in zip(group_mats, packed["group_wts"]):
        ins.append(gm)
        ins.append(gw)
    groups_meta = tuple((g["count"], tuple(g["runs"])) for g in plan["groups"])
    kern = functools.partial(_embed_kernel, B=B, P=P, Lf=Lf, nL=nL, groups=groups_meta)
    return pl.pallas_call(
        kern,
        out_shape=jax.ShapeDtypeStruct((B * Lf, E), jnp.float32),
        grid=(1,),
        in_specs=[_fullspec(a.shape) for a in ins],
        out_specs=_fullspec((B * Lf, E)),
        compiler_params=_CP1,
    )(*ins)


def pallas_layers(seq0, lpos, packed, cfg, B, Lf):
    E = cfg["embed_dim"]
    F = cfg["dim_feedforward"]
    nL = cfg["num_layers"]
    H = cfg["num_heads"]
    st = packed["stacked"]
    ins = [lpos, seq0, st["win"], st["bin"], st["wo"], st["bo"],
           st["g1"], st["be1"], st["g2"], st["be2"],
           st["w1"], st["b1"], st["w2"], st["b2"],
           packed["fin_g"], packed["fin_b"]]
    in_specs = [_fullspec((B * Lf, 1)), _fullspec((B * Lf, E)),
                _stackspec((E, 3 * E)), _stackspec((1, 3 * E)),
                _stackspec((E, E)), _stackspec((1, E)),
                _stackspec((1, E)), _stackspec((1, E)),
                _stackspec((1, E)), _stackspec((1, E)),
                _stackspec((E, F)), _stackspec((1, F)),
                _stackspec((F, E)), _stackspec((1, E)),
                _fullspec((1, E)), _fullspec((1, E))]
    kern = functools.partial(_layers_kernel, B=B, Lf=Lf, E=E, H=H, nL=nL)
    return pl.pallas_call(
        kern,
        out_shape=jax.ShapeDtypeStruct((B * Lf, E), jnp.float32),
        grid=(nL,),
        in_specs=in_specs,
        out_specs=_fullspec((B * Lf, E)),
        scratch_shapes=[pltpu.VMEM((B * Lf, E), jnp.float32)],
        compiler_params=_CP1,
    )(*ins)


def pallas_head(xflat, packed, cfg):
    B = xflat.shape[0]
    ncls = packed["head_b"].shape[1]
    ins = [xflat, packed["dyn_wt"], packed["dyn_b"], packed["head_wt"], packed["head_b"]]
    return pl.pallas_call(
        _head_kernel,
        out_shape=jax.ShapeDtypeStruct((B, ncls), jnp.float32),
        grid=(1,),
        in_specs=[_fullspec(a.shape) for a in ins],
        out_specs=_fullspec((B, ncls)),
        compiler_params=_CP1,
    )(*ins)


# ---------------------------------------------------------------------------
# Parameter initialization (deterministic, synthetic)
# ---------------------------------------------------------------------------

def init_params(key, cfg):
    C, E, ps = cfg["in_channels"], cfg["embed_dim"], cfg["patch_size"]
    P, nL = cfg["num_patches"], cfg["num_layers"]
    keys = iter(jax.random.split(key, 64))

    def lin(out_f, in_f):
        bnd = 1.0 / math.sqrt(in_f)
        w = jax.random.uniform(next(keys), (out_f, in_f), jnp.float32, -bnd, bnd)
        b = jax.random.uniform(next(keys), (out_f,), jnp.float32, -bnd, bnd)
        return w, b

    p = {}
    # TODO(synk): backbone is an external nn.Module argument; stand-in = GAP + Linear(C->E).
    p["backbone_w"], p["backbone_b"] = lin(E, C)

    bnd = 1.0 / math.sqrt(C * ps * ps)
    p["patch_w"] = jax.random.uniform(next(keys), (E, C, ps, ps), jnp.float32, -bnd, bnd)
    p["patch_b"] = jax.random.uniform(next(keys), (E,), jnp.float32, -bnd, bnd)
    # TODO(synk): CLSToken2 is not defined in the source file; stand-in = patch conv + GAP.
    p["cls_w"] = jax.random.uniform(next(keys), (E, C, ps, ps), jnp.float32, -bnd, bnd)
    p["cls_b"] = jax.random.uniform(next(keys), (E,), jnp.float32, -bnd, bnd)

    p["liw_fc_w"], p["liw_fc_b"] = lin(128, P)
    p["liw_out_w"], p["liw_out_b"] = lin(P, 128)
    p["importance_weights"] = jnp.full((P,), 1.0 / P, jnp.float32)   # softmax(ones)
    p["sigma"] = np.float32(2.0)
    mean = (P - 1) / 2.0
    p["mean"] = np.float32(min(max(mean, (P - 1) / 3.0), 2 * (P - 1) / 3.0))

    layers = []
    for _ in range(nL):
        lp = {}
        lp["in_proj_w"], lp["in_proj_b"] = lin(3 * E, E)
        lp["out_proj_w"], lp["out_proj_b"] = lin(E, E)
        lp["lin1_w"], lp["lin1_b"] = lin(cfg["dim_feedforward"], E)
        lp["lin2_w"], lp["lin2_b"] = lin(E, cfg["dim_feedforward"])
        lp["norm1_g"] = jnp.ones((E,), jnp.float32)
        lp["norm1_b"] = jnp.zeros((E,), jnp.float32)
        lp["norm2_g"] = jnp.ones((E,), jnp.float32)
        lp["norm2_b"] = jnp.zeros((E,), jnp.float32)
        layers.append(lp)
    p["layers"] = layers

    p["final_ln_g"] = jnp.ones((E,), jnp.float32)
    p["final_ln_b"] = jnp.zeros((E,), jnp.float32)
    p["dyn_w"], p["dyn_b"] = lin(cfg["mlp_dim"], (P + 1 + nL) * E)
    p["head_w"], p["head_b"] = lin(cfg["num_classes"], cfg["mlp_dim"])
    return p


# ---------------------------------------------------------------------------
# Plan phase (params-only, host decision) and weight packing
# ---------------------------------------------------------------------------

def build_plan(params, cfg):
    """Run the LIW kernel and derive the (static) patch-subdivision plan from its output."""
    P = cfg["num_patches"]
    ps = cfg["patch_size"]
    img = cfg["img_size"]

    posns = np.arange(P, dtype=np.float32)
    mean = np.float32(params["mean"])
    sigma = np.float32(params["sigma"])
    gauss = np.exp(-0.5 * ((posns - mean) / sigma) ** 2).astype(np.float32) + np.float32(1e-41)
    gw = (gauss / gauss.sum()).reshape(1, P).astype(np.float32)

    iw = jnp.asarray(params["importance_weights"], jnp.float32).reshape(1, P)
    fcw_t = jnp.asarray(params["liw_fc_w"], jnp.float32).T
    fcb = jnp.asarray(params["liw_fc_b"], jnp.float32).reshape(1, -1)
    ow_t = jnp.asarray(params["liw_out_w"], jnp.float32).T
    ob = jnp.asarray(params["liw_out_b"], jnp.float32).reshape(1, -1)

    new_w, kld = pallas_liw(iw, jnp.asarray(gw), fcw_t, fcb, ow_t, ob)
    kld = kld.reshape(())

    # Data-dependent patch layout: depends on params only, resolved once on the host.
    w_host = np.asarray(jax.device_get(new_w)).reshape(P).astype(np.float64)
    avg = w_host.mean()
    sizes_f = np.minimum(ps * (avg ** 12) / (w_host ** 12), float(ps))
    new_patch_sizes = [min([32, 16, 8], key=lambda s: abs(s - float(v))) for v in sizes_f]

    H = img                                             # PyTorch uses x.shape[3]
    tokens = []                                         # (size, blk_row, blk_col, parent)
    subpatch_counts = []
    for i in range(P):
        size = new_patch_sizes[i]
        ini_col = (i * ps) % H
        ini_row = (i * ps) // H * ps
        if size < ps and size > 7:
            rs = ps // size
            for j in range(rs * rs):
                sc = ini_col + (j * size) % (rs * size)
                sr = ini_row + (j * size) // (rs * size) * size
                tokens.append((size, sr // size, sc // size, i))
            subpatch_counts.append(rs * rs)
        else:
            tokens.append((ps, ini_row // ps, ini_col // ps, i))
            subpatch_counts.append(1)
    T = len(tokens)

    groups = []
    for s in sorted(set(t[0] for t in tokens)):
        tok_pos = [t for t, tk in enumerate(tokens) if tk[0] == s]
        blk_idx = [tokens[t][1] * (img // s) + tokens[t][2] for t in tok_pos]
        runs = []                                       # (start-in-group, length, token-start)
        start_j = 0
        for j in range(1, len(tok_pos) + 1):
            if j == len(tok_pos) or tok_pos[j] != tok_pos[j - 1] + 1:
                runs.append((start_j, j - start_j, tok_pos[start_j]))
                start_j = j
        groups.append(dict(size=s, count=len(tok_pos), tok_pos=tok_pos,
                           blk_idx=blk_idx, runs=runs))

    grid_idx = []
    for i in range(P):
        ini_col = (i * ps) % H
        ini_row = (i * ps) // H * ps
        grid_idx.append((ini_row // ps) * (img // ps) + ini_col // ps)

    plan = dict(new_patch_sizes=new_patch_sizes, subpatch_counts=subpatch_counts,
                T_total=T, groups=groups, grid_idx=grid_idx,
                parents=[tk[3] for tk in tokens])
    return plan, kld


def pack_params(params, cfg, plan):
    """Pre-pack weights once: (K, N) layout, bf16 matmul operands, (1, N) f32 biases;
    per-layer weights stacked along a leading nL axis for the single grid'ed layer call."""
    E = cfg["embed_dim"]
    C = cfg["in_channels"]
    ps = cfg["patch_size"]
    P = cfg["num_patches"]
    nL = cfg["num_layers"]
    bf16 = jnp.bfloat16
    f32 = jnp.float32
    pk = {}

    pk["backbone_wt"] = jnp.asarray(params["backbone_w"], f32).T.astype(bf16)   # (C, E)
    pk["backbone_b"] = jnp.asarray(params["backbone_b"], f32).reshape(1, E)

    patch_w = jnp.asarray(params["patch_w"], f32)
    pk["patch_b"] = jnp.asarray(params["patch_b"], f32).reshape(1, E)
    group_wts = []
    for g in plan["groups"]:
        s = g["size"]
        if s == ps:
            Wmat = patch_w.reshape(E, C * ps * ps)
        else:
            kd = ps // s
            # Matches PyTorch's raw .view(E, C, kd, kd, s, s).mean(2).mean(2).
            Wmat = patch_w.reshape(E, C, kd, kd, s, s).mean(axis=2).mean(axis=2)
            Wmat = Wmat.reshape(E, C * s * s)
        group_wts.append(Wmat.T.astype(bf16))                                   # (K_g, E)
    pk["group_wts"] = group_wts

    pk["cls_wt"] = jnp.asarray(params["cls_w"], f32).reshape(E, C * ps * ps).T.astype(bf16)
    pk["cls_b"] = jnp.asarray(params["cls_b"], f32).reshape(1, E)

    # TODO(synk): posencDPD is not defined in the source file; stand-in = sinusoidal PE at
    # the parent-patch index (repeated per subpatch); cls row stays zero (cls_posenc).
    T = plan["T_total"]
    positions = np.asarray(plan["parents"], np.float32)
    div = np.exp(np.arange(0, E, 2, dtype=np.float32) * (-math.log(10000.0) / E))
    pe = np.zeros((T, E), np.float32)
    pe[:, 0::2] = np.sin(positions[:, None] * div)
    pe[:, 1::2] = np.cos(positions[:, None] * div)
    pk["pos_embed"] = jnp.asarray(pe)

    win, binp, wo, bo = [], [], [], []
    g1, be1, g2, be2 = [], [], [], []
    w1, b1, w2, b2 = [], [], [], []
    for lp in params["layers"]:
        w = jnp.asarray(lp["in_proj_w"], f32)                                   # (3E, E)
        win.append(w.T)                                                         # (E, 3E)
        binp.append(jnp.asarray(lp["in_proj_b"], f32).reshape(1, 3 * E))
        wo.append(jnp.asarray(lp["out_proj_w"], f32).T)
        bo.append(jnp.asarray(lp["out_proj_b"], f32).reshape(1, E))
        w1.append(jnp.asarray(lp["lin1_w"], f32).T)
        b1.append(jnp.asarray(lp["lin1_b"], f32).reshape(1, -1))
        w2.append(jnp.asarray(lp["lin2_w"], f32).T)
        b2.append(jnp.asarray(lp["lin2_b"], f32).reshape(1, E))
        g1.append(jnp.asarray(lp["norm1_g"], f32).reshape(1, E))
        be1.append(jnp.asarray(lp["norm1_b"], f32).reshape(1, E))
        g2.append(jnp.asarray(lp["norm2_g"], f32).reshape(1, E))
        be2.append(jnp.asarray(lp["norm2_b"], f32).reshape(1, E))
    pk["stacked"] = dict(
        win=jnp.stack(win).astype(bf16), bin=jnp.stack(binp),
        wo=jnp.stack(wo).astype(bf16), bo=jnp.stack(bo),
        g1=jnp.stack(g1), be1=jnp.stack(be1), g2=jnp.stack(g2), be2=jnp.stack(be2),
        w1=jnp.stack(w1).astype(bf16), b1=jnp.stack(b1),
        w2=jnp.stack(w2).astype(bf16), b2=jnp.stack(b2))

    pk["fin_g"] = jnp.asarray(params["final_ln_g"], f32).reshape(1, E)
    pk["fin_b"] = jnp.asarray(params["final_ln_b"], f32).reshape(1, E)

    # DynamicLinear weight rearrangement (old_subpatch_counts == [1]*P), packed as one
    # (Lf*E, mlp) matrix so the head is a single K = Lf*E contraction.
    weight = jnp.asarray(params["dyn_w"], f32)                   # (mlp, (P+1+nL)*E)
    counts = plan["subpatch_counts"]
    if counts != [1] * P:
        ini = (nL + 1) * E
        parts = [weight[:, :ini]]
        for num in counts:
            wslice = weight[:, ini:ini + E]
            parts.append(jnp.concatenate([wslice] * num, axis=-1) if num != 1 else wslice)
            ini += E
        final_weight = jnp.concatenate(parts, axis=-1)
    else:
        final_weight = weight
    pk["dyn_wt"] = final_weight.T.astype(bf16)                   # (Lf*E, mlp)
    pk["dyn_b"] = jnp.asarray(params["dyn_b"], f32).reshape(1, -1)
    pk["head_wt"] = jnp.asarray(params["head_w"], f32).T.astype(bf16)            # (mlp, ncls)
    pk["head_b"] = jnp.asarray(params["head_b"], f32).reshape(1, -1)
    return pk


# ---------------------------------------------------------------------------
# Forward pass (jittable; plan/cfg are static)
# ---------------------------------------------------------------------------

def _space_to_depth(x, s):
    B, C, Hh, Ww = x.shape
    nr, nc = Hh // s, Ww // s
    y = x.reshape(B, C, nr, s, nc, s).transpose(0, 2, 4, 1, 3, 5)
    return y.reshape(B, nr * nc, C * s * s)              # (C, kh, kw) C-order per block


def ievit_forward(packed, x, *, cfg, plan):
    B, C, _, _ = x.shape
    ps = cfg["patch_size"]
    P = cfg["num_patches"]
    nL = cfg["num_layers"]
    E = cfg["embed_dim"]
    T = plan["T_total"]
    Lf = nL + 1 + T
    x = x.astype(jnp.float32)

    gap = jnp.mean(x, axis=(2, 3))                        # backbone stand-in input (B, C)

    s2d_cache = {}

    def s2d(s):
        if s not in s2d_cache:
            s2d_cache[s] = _space_to_depth(x, s)
        return s2d_cache[s]

    group_mats = []
    for g in plan["groups"]:
        s = g["size"]
        sel = s2d(s)[:, jnp.asarray(g["blk_idx"], jnp.int32), :]      # (B, n_g, K_g)
        group_mats.append(sel.reshape(B * g["count"], C * s * s))
    grid16 = s2d(ps)[:, jnp.asarray(plan["grid_idx"], jnp.int32), :].reshape(B * P, C * ps * ps)

    # Embedding stage: builds the fixed-length (B*Lf, E) sequence buffer.
    seq0 = pallas_embed(gap, grid16, group_mats, packed, plan, cfg, B, Lf)

    # All nL encoder layers (+ final LayerNorm) in one grid'ed pallas_call.
    lpos = jnp.tile(jnp.arange(Lf, dtype=jnp.int32).reshape(Lf, 1), (B, 1))   # (B*Lf, 1)
    seq_ln = pallas_layers(seq0, lpos, packed, cfg, B, Lf)                    # (B*Lf, E)

    # Free row-major reshape (no transpose / extra HBM traffic), then the head kernel.
    xflat = seq_ln.reshape(B, Lf * E)
    logits = pallas_head(xflat, packed, cfg)
    return logits


# ---------------------------------------------------------------------------
# Main
# ---------------------------------------------------------------------------

if __name__ == "__main__":
    cfg = dict(img_size=32, patch_size=16, in_channels=3, num_classes=5,
               embed_dim=32, num_heads=4, num_layers=2, dim_feedforward=64,
               mlp_dim=64)
    assert cfg["img_size"] % cfg["patch_size"] == 0
    cfg["num_patches"] = (cfg["img_size"] // cfg["patch_size"]) ** 2

    key = jax.random.PRNGKey(0)
    pkey, xkey = jax.random.split(key)
    params = init_params(pkey, cfg)
    x = jax.random.normal(xkey, (2, cfg["in_channels"], cfg["img_size"], cfg["img_size"]),
                          dtype=jnp.float32)

    # Plan phase: LIW kernel + host-side patch-subdivision decision (params-only).
    plan, kld = build_plan(params, cfg)
    packed = pack_params(params, cfg, plan)

    fwd = jax.jit(functools.partial(ievit_forward, cfg=cfg, plan=plan))
    logits = fwd(packed, x)

    jax.block_until_ready((logits, kld))
    assert logits.shape == (2, cfg["num_classes"])
    assert kld.shape == ()
    assert bool(jnp.all(jnp.isfinite(logits)))
    print("KERNEL_OK")
</pallas_src>

<mosaic_0001>
module attributes {stable_mosaic.version = 11 : i64} {
  func.func @_liw_kernel(%arg0: i32, %arg1: memref<1x4xf32, #tpu.memory_space<vmem>>, %arg2: memref<4x128xf32, #tpu.memory_space<vmem>>, %arg3: memref<1x128xf32, #tpu.memory_space<vmem>>, %arg4: memref<128x4xf32, #tpu.memory_space<vmem>>, %arg5: memref<1x4xf32, #tpu.memory_space<vmem>>, %arg6: memref<1x4xf32, #tpu.memory_space<vmem>>, %arg7: memref<1x4xf32, #tpu.memory_space<vmem>>, %arg8: memref<1x1xf32, #tpu.memory_space<vmem>>) attributes {dimension_semantics = [#tpu.dimension_semantics<arbitrary>], iteration_bounds = array<i64: 1>, scalar_prefetch = 0 : i64, scratch_operands = 0 : i64, tpu.core_type = #tpu.core_type<tc>, window_params = [{pipeline_mode = #tpu.pipeline_mode<synchronous>, transform_indices = @transform_0, window_bounds = array<i64: 1, 4>}, {pipeline_mode = #tpu.pipeline_mode<synchronous>, transform_indices = @transform_1, window_bounds = array<i64: 4, 128>}, {pipeline_mode = #tpu.pipeline_mode<synchronous>, transform_indices = @transform_2, window_bounds = array<i64: 1, 128>}, {pipeline_mode = #tpu.pipeline_mode<synchronous>, transform_indices = @transform_3, window_bounds = array<i64: 128, 4>}, {pipeline_mode = #tpu.pipeline_mode<synchronous>, transform_indices = @transform_4, window_bounds = array<i64: 1, 4>}, {pipeline_mode = #tpu.pipeline_mode<synchronous>, transform_indices = @transform_5, window_bounds = array<i64: 1, 4>}, {pipeline_mode = #tpu.pipeline_mode<synchronous>, transform_indices = @transform_6, window_bounds = array<i64: 1, 4>}, {pipeline_mode = #tpu.pipeline_mode<synchronous>, transform_indices = @transform_7, window_bounds = array<i64: 1, 1>}]} {
    %c0 = arith.constant 0 : index
    %c0_0 = arith.constant 0 : index
    %0 = vector.load %arg1[%c0, %c0_0] : memref<1x4xf32, #tpu.memory_space<vmem>>, vector<1x4xf32>
    %c0_1 = arith.constant 0 : index
    %c0_2 = arith.constant 0 : index
    %1 = vector.load %arg2[%c0_1, %c0_2] : memref<4x128xf32, #tpu.memory_space<vmem>>, vector<4x128xf32>
    %cst = arith.constant dense<0.000000e+00> : vector<1x128xf32>
    %2 = tpu.matmul %0, %1, %cst {dimension_numbers = #tpu.dot_dimension_numbers<[1], [0], [0], [1], [0, 0, 1, 1], [], []>} : vector<1x4xf32>, vector<4x128xf32>, vector<1x128xf32> -> vector<1x128xf32>
    %c0_3 = arith.constant 0 : index
    %c0_4 = arith.constant 0 : index
    %3 = vector.load %arg3[%c0_3, %c0_4] : memref<1x128xf32, #tpu.memory_space<vmem>>, vector<1x128xf32>
    %4 = arith.addf %2, %3 : vector<1x128xf32>
    %cst_5 = arith.constant 0.000000e+00 : f32
    %5 = vector.broadcast %cst_5 : f32 to vector<1x128xf32>
    %6 = arith.maximumf %4, %5 : vector<1x128xf32>
    %c0_6 = arith.constant 0 : index
    %c0_7 = arith.constant 0 : index
    %7 = vector.load %arg4[%c0_6, %c0_7] : memref<128x4xf32, #tpu.memory_space<vmem>>, vector<128x4xf32>
    %cst_8 = arith.constant dense<0.000000e+00> : vector<1x4xf32>
    %8 = tpu.matmul %6, %7, %cst_8 {dimension_numbers = #tpu.dot_dimension_numbers<[1], [0], [0], [1], [0, 0, 1, 1], [], []>} : vector<1x128xf32>, vector<128x4xf32>, vector<1x4xf32> -> vector<1x4xf32>
    %c0_9 = arith.constant 0 : index
    %c0_10 = arith.constant 0 : index
    %9 = vector.load %arg5[%c0_9, %c0_10] : memref<1x4xf32, #tpu.memory_space<vmem>>, vector<1x4xf32>
    %10 = arith.addf %8, %9 : vector<1x4xf32>
    %cst_11 = arith.constant dense<0xFF800000> : vector<1xf32>
    %11 = vector.multi_reduction <maximumf>, %10, %cst_11 [1] : vector<1x4xf32> to vector<1xf32>
    %12 = vector.shape_cast %11 : vector<1xf32> to vector<1x1xf32>
    %13 = vector.broadcast %12 : vector<1x1xf32> to vector<1x4xf32>
    %14 = arith.subf %10, %13 : vector<1x4xf32>
    %15 = math.exp %14 : vector<1x4xf32>
    %cst_12 = arith.constant dense<0.000000e+00> : vector<1xf32>
    %16 = vector.multi_reduction <add>, %15, %cst_12 [1] : vector<1x4xf32> to vector<1xf32>
    %17 = vector.shape_cast %16 : vector<1xf32> to vector<1x1xf32>
    %18 = tpu.reciprocal %17 : vector<1x1xf32> -> vector<1x1xf32>
    %19 = vector.broadcast %18 : vector<1x1xf32> to vector<1x4xf32>
    %20 = arith.mulf %15, %19 : vector<1x4xf32>
    %c0_13 = arith.constant 0 : index
    %c0_14 = arith.constant 0 : index
    %21 = vector.load %arg7[%c0_13, %c0_14] : memref<1x4xf32, #tpu.memory_space<vmem>>, vector<1x4xf32>
    tpu.vector_store %arg7[%c0_13, %c0_14], %20 {strides = array<i32>} : memref<1x4xf32, #tpu.memory_space<vmem>>, vector<1x4xf32>,
    %c0_15 = arith.constant 0 : index
    %c0_16 = arith.constant 0 : index
    %22 = vector.load %arg6[%c0_15, %c0_16] : memref<1x4xf32, #tpu.memory_space<vmem>>, vector<1x4xf32>
    %23 = vector.broadcast %12 : vector<1x1xf32> to vector<1x4xf32>
    %24 = arith.subf %10, %23 : vector<1x4xf32>
    %25 = math.log %17 : vector<1x1xf32>
    %26 = vector.broadcast %25 : vector<1x1xf32> to vector<1x4xf32>
    %27 = arith.subf %24, %26 : vector<1x4xf32>
    %cst_17 = arith.constant 0.000000e+00 : f32
    %28 = vector.broadcast %cst_17 : f32 to vector<1x4xf32>
    %29 = arith.cmpf ogt, %22, %28 : vector<1x4xf32>
    %cst_18 = arith.constant 1.000000e-30 : f32
    %30 = vector.broadcast %cst_18 : f32 to vector<1x4xf32>
    %31 = arith.maximumf %22, %30 : vector<1x4xf32>
    %32 = math.log %31 : vector<1x4xf32>
    %33 = arith.subf %32, %27 : vector<1x4xf32>
    %34 = arith.mulf %22, %33 : vector<1x4xf32>
    %cst_19 = arith.constant 0.000000e+00 : f32
    %35 = vector.broadcast %cst_19 : f32 to vector<1x4xf32>
    %36 = arith.select %29, %34, %35 : vector<1x4xi1>, vector<1x4xf32>
    %cst_20 = arith.constant dense<0.000000e+00> : vector<1xf32>
    %37 = vector.multi_reduction <add>, %36, %cst_20 [1] : vector<1x4xf32> to vector<1xf32>
    %38 = vector.shape_cast %37 : vector<1xf32> to vector<1x1xf32>
    %c0_21 = arith.constant 0 : index
    %c0_22 = arith.constant 0 : index
    %39 = vector.load %arg8[%c0_21, %c0_22] : memref<1x1xf32, #tpu.memory_space<vmem>>, vector<1x1xf32>
    tpu.vector_store %arg8[%c0_21, %c0_22], %38 {strides = array<i32>} : memref<1x1xf32, #tpu.memory_space<vmem>>, vector<1x1xf32>,
    return
  }
  func.func @transform_0(%arg0: i32) -> (i32, i32) {
    %c0_i32 = arith.constant 0 : i32
    %c0_i32_0 = arith.constant 0 : i32
    %c0_i32_1 = arith.constant 0 : i32
    return %c0_i32, %c0_i32_0 : i32, i32
  }
  func.func @transform_1(%arg0: i32) -> (i32, i32) {
    %c0_i32 = arith.constant 0 : i32
    %c0_i32_0 = arith.constant 0 : i32
    %c0_i32_1 = arith.constant 0 : i32
    return %c0_i32, %c0_i32_0 : i32, i32
  }
  func.func @transform_2(%arg0: i32) -> (i32, i32) {
    %c0_i32 = arith.constant 0 : i32
    %c0_i32_0 = arith.constant 0 : i32
    %c0_i32_1 = arith.constant 0 : i32
    return %c0_i32, %c0_i32_0 : i32, i32
  }
  func.func @transform_3(%arg0: i32) -> (i32, i32) {
    %c0_i32 = arith.constant 0 : i32
    %c0_i32_0 = arith.constant 0 : i32
    %c0_i32_1 = arith.constant 0 : i32
    return %c0_i32, %c0_i32_0 : i32, i32
  }
  func.func @transform_4(%arg0: i32) -> (i32, i32) {
    %c0_i32 = arith.constant 0 : i32
    %c0_i32_0 = arith.constant 0 : i32
    %c0_i32_1 = arith.constant 0 : i32
    return %c0_i32, %c0_i32_0 : i32, i32
  }
  func.func @transform_5(%arg0: i32) -> (i32, i32) {
    %c0_i32 = arith.constant 0 : i32
    %c0_i32_0 = arith.constant 0 : i32
    %c0_i32_1 = arith.constant 0 : i32
    return %c0_i32, %c0_i32_0 : i32, i32
  }
  func.func @transform_6(%arg0: i32) -> (i32, i32) {
    %c0_i32 = arith.constant 0 : i32
    %c0_i32_0 = arith.constant 0 : i32
    %c0_i32_1 = arith.constant 0 : i32
    return %c0_i32, %c0_i32_0 : i32, i32
  }
  func.func @transform_7(%arg0: i32) -> (i32, i32) {
    %c0_i32 = arith.constant 0 : i32
    %c0_i32_0 = arith.constant 0 : i32
    %c0_i32_1 = arith.constant 0 : i32
    return %c0_i32, %c0_i32_0 : i32, i32
  }
}

</mosaic_0001>

<bundles_post_ra>
// kernel: tpu_custom_call.1
= control target key start
LH: loop header
LB: loop body
LE: loop exit
PB: predicated region body
PF: predicated region fallthrough
CT: control target
= control target key end

     0   :  { %13 = vsyncpa [#allocation3], 0  ;;  %vm34_vm0 = vcmask 1043456   ;;  %vm30_vm1 = vcmask 31744   ;;  %v399_v1 = vmov 0.0   ;;  %vm400_vm2 = vmmov 0   ;;  %s535_s0 = inlined_call_operand.vmem [shape: f32[1,4], index: 0, kind: input, shape index: {}]   ;;  %s536_s1 = inlined_call_operand.vmem [shape: f32[4,128], index: 1, kind: input, shape index: {}]   ;;  %s537_s2 = inlined_call_operand.vmem [shape: f32[1,128], index: 2, kind: input, shape index: {}]   ;;  %s538_s3 = inlined_call_operand.vmem [shape: f32[128,4], index: 3, kind: input, shape index: {}]   ;;  %s539_s4 = inlined_call_operand.vmem [shape: f32[1,4], index: 4, kind: input, shape index: {}]   ;;  %s540_s5 = inlined_call_operand.vmem [shape: f32[1,4], index: 5, kind: input, shape index: {}]   ;;  %s541_s6 = inlined_call_operand.hbm [shape: f32[1,4], index: 6, kind: output, shape index: {0}]   ;;  %s542_s7 = inlined_call_operand.hbm [shape: f32[1,1], index: 7, kind: output, shape index: {1}]  }
   0x1   :  { %v28_v0 = vld [vmem:[%s536_s1] sm:$0xf]  ;;  %274 = vmatprep.subr.mxu0 %v399_v1  ;;  %276 = vmatprep.mubr.msk.f32.mxu0 %vm400_vm2, %v399_v1  ;;  %v110_v4 = vld [vmem:[%s538_s3 + $0x8] sm:$0xff]  ;;  %v401_v5 = vmov 0.0|0.0   ;;  %v111_v7 = vld [vmem:[%s538_s3 + $0x10] sm:$0xff] }
   0x2   :  { %v27_v2 = vld [vmem:[%s535_s0] sm:$0x1]  ;;  %275 = vmatpush3.msk.msra.mxu0 %vm34_vm0, %v28_v0  ;;  %314 = vmatprep.subr.bf16.mxu1 %v401_v5  ;;  %v112_v8 = vld [vmem:[%s538_s3 + $0x18] sm:$0xff]  ;;  %v114_v11 = vld [vmem:[%s538_s3 + $0x28] sm:$0xff] }
   0x3   :  { %v109_v3 = vld [vmem:[%s538_s3] sm:$0xff]  ;;  %277 = vmatmul.mubr.msk.f32.vlgmr.msra.gmra.mrb[0].mxu0 %vm30_vm1, %v27_v2  ;;  %311 = vmatprep.mubr.msk.f32.mxu1 %vm400_vm2, %v399_v1  ;;  %v318_v9 = vpack.c.bf16 %v112_v8, %v111_v7 }
   0x4   :  { %v315_v6 = vpack.c.bf16 %v110_v4, %v109_v3  ;;  %v113_v10 = vld [vmem:[%s538_s3 + $0x20] sm:$0xff] }
   0x6   :  { %316 = vmatpush3.bf16.msra.mxu1 %v315_v6 }
   0x7   :  { %317 = vmatprep.subr.bf16.mxu1 %v401_v5 }
   0x8   :  { %14 = vsyncpa [#allocation5], 0  ;;  %v321_v12 = vpack.c.bf16 %v114_v11, %v113_v10  ;;  %v115_v13 = vld [vmem:[%s538_s3 + $0x30] sm:$0xff]  ;;  %v116_v14 = vld [vmem:[%s538_s3 + $0x38] sm:$0xff]  ;;  %vm196_vm3 = vcmask 24576  }
   0x9   :  { %v324_v15 = vpack.c.bf16 %v116_v14, %v115_v13  ;;  %v117_v16 = vld [vmem:[%s538_s3 + $0x40] sm:$0xff]  ;;  %v118_v17 = vld [vmem:[%s538_s3 + $0x48] sm:$0xff]  ;;  %v119_v19 = vld [vmem:[%s538_s3 + $0x50] sm:$0xff] }
   0xa   :  { %319 = vmatpush3.bf16.msra.mxu1 %v318_v9  ;;  %v327_v18 = vpack.c.bf16 %v118_v17, %v117_v16  ;;  %v120_v20 = vld [vmem:[%s538_s3 + $0x58] sm:$0xff]  ;;  %v121_v22 = vld [vmem:[%s538_s3 + $0x60] sm:$0xff]  ;;  %v122_v23 = vld [vmem:[%s538_s3 + $0x68] sm:$0xff] }
   0xb   :  { %320 = vmatprep.subr.bf16.mxu1 %v401_v5  ;;  %v330_v21 = vpack.c.bf16 %v120_v20, %v119_v19  ;;  %v333_v24 = vpack.c.bf16 %v122_v23, %v121_v22  ;;  %v123_v25 = vld [vmem:[%s538_s3 + $0x70] sm:$0xff]  ;;  %v124_v26 = vld [vmem:[%s538_s3 + $0x78] sm:$0xff]  ;;  %v29_v28 = vld [vmem:[%s537_s2] sm:$0x1] }
   0xc   :  { %v336_v27 = vpack.c.bf16 %v124_v26, %v123_v25  ;;  %v125_v33 = vld [vmem:[%s539_s4] sm:$0x1]  ;;  %s402_s4 = smov [#allocation2]  }
   0xd   :  { %v209_v43 = vld [vmem:[%s540_s5] sm:$0x1]  ;;  %s231_s5 = sshll.u32 %s402_s4, 4  ;;  %s232_s5 = int_to_ptr.vmem [resolvable:$true] %s231_s5 }
   0xe   :  { %322 = vmatpush3.bf16.msra.mxu1 %v321_v12  ;;  %v214_v44 = vmax.f32 %v209_v43, 1e-30  ;;  %vm213_vm4 = vcmp.gt.f32.partialorder %v209_v43, 0.0  ;;  %s351_s14 = scalar_lea.vmem %s232_s5, 16  ;;  %s355_s15 = scalar_lea.vmem %s232_s5, 32 }
   0xf   :  { %323 = vmatprep.subr.bf16.mxu1 %v401_v5  ;;  %p352_p0 = scmp.ne.s32.totalorder %s232_s5, %s351_s14  ;;  %p356_p1 = scmp.lt.s32.totalorder %s232_s5, %s232_s5 }
  0x10   :  { %p357_p2 = scmp.lt.s32.totalorder %s355_s15, %s351_s14 }
  0x12   :  { %325 = vmatpush3.bf16.msra.mxu1 %v324_v15  ;;  %p358_p3 = por %p357_p2, %p356_p1 }
  0x13   :  { %326 = vmatprep.subr.bf16.mxu1 %v401_v5 }
  0x14   :  { %p359_p4 = pnand %p358_p3, %p352_p0 }
  0x16   :  { %328 = vmatpush3.bf16.msra.mxu1 %v327_v18 }
  0x17   :  { %329 = vmatprep.subr.bf16.mxu1 %v401_v5 }
  0x1a   :  { %331 = vmatpush3.bf16.msra.mxu1 %v330_v21 }
  0x1b   :  { %332 = vmatprep.subr.bf16.mxu1 %v401_v5 }
  0x1e   :  { %334 = vmatpush3.bf16.msra.mxu1 %v333_v24 }
  0x1f   :  { %335 = vmatprep.subr.bf16.mxu1 %v401_v5 }
  0x22   :  { %337 = vmatpush3.bf16.msra.mxu1 %v336_v27 }
  0xd6   :  { %v104_v29 = vpop.f32.mrb[0].mxu0 }
  0xd7   :  { %v105_v30 = vadd.f32 %v104_v29, %v29_v28  ;;  %v278_v31 = vpop.f32.mrb[1].mxu0 }
  0xd9   :  { %v108_v32 = vmax.f32 %v105_v30, 0.0 }
  0xdb   :  { %312 = vmatmul.mubr.f32.vlgmr.msra.gmra.mrb[0].mxu1 %v108_v32 }
 0x1ae   :  { %v192_v34 = vpop.f32.mrb[0].mxu1 }
 0x1af   :  { %v193_v35 = vadd.f32 %v192_v34, %v125_v33  ;;  %v313_v36 = vpop.f32.mrb[1].mxu1 }
 0x1b1   :  { %v197_v37 = vsel %vm196_vm3, %v193_v35, -inf }
 0x1b2   :  { %198 = vmax.xlane.f32.xlu0 %v197_v37 }
 0x23f   :  { %v199_v38 = vpop.xlane.xlu0 %198 }
 0x240   :  { %v200_v39 = vsub.f32 %v193_v35, %v199_v38 }
 0x242   :  { %v201_v40 = vmul.f32 1.442695, %v200_v39 }
 0x244   :  { %343 = vpow2.f32 %v201_v40 }
 0x245   :  { %345 = vlog2.f32 %v214_v44 }
 0x24e   :  { %v344_v41 = vpop.eup %343 }
 0x24f   :  { %v203_v42 = vsel %vm196_vm3, %v344_v41, 0.0  ;;  %v346_v46 = vpop.eup %345 }
 0x250   :  { %204 = vadd.xlane.f32.xlu0 %v203_v42  ;;  %v216_v51 = vmul.f32 0.6931472, %v346_v46 }
 0x2dd   :  { %v205_v45 = vpop.xlane.xlu0 %204 }
 0x2de   :  { %347 = vrcp.f32 %v205_v45 }
 0x2df   :  { %349 = vlog2.f32 %v205_v45 }
 0x2e8   :  { %v348_v47 = vpop.eup %347 }
 0x2e9   :  { %v350_v48 = vpop.eup %349  ;;  %v207_v49 = vmul.f32 %v348_v47, %v344_v41 }
 0x2ea   :  { %v211_v50 = vmul.f32 0.6931472, %v350_v48 }
 0x2eb   :  { %208 = vst.msk [vmem:[#allocation2] sm:$0x1] %vm196_vm3, %v207_v49 }
 0x2ec   :  { %v212_v52 = vsub.f32 %v200_v39, %v211_v50 }
 0x2ee   :  { %v217_v53 = vsub.f32 %v216_v51, %v212_v52 }
 0x2f0   :  { %v218_v54 = vmul.f32 %v217_v53, %v209_v43 }
 0x2f2   :  { %v219_v55 = vsel %vm213_vm4, %v218_v54, 0.0 }
 0x2f3   :  { %v220_v56 = vsel %vm196_vm3, %v219_v55, 0.0 }
 0x2f4   :  { %221 = vadd.xlane.f32.xlu1 %v220_v56 }
 0x2f5   :  { %362 = shalt.err (!%p359_p4)
}
 0x2f6   :  { %s363_s18 = scalar_lea.hbm %s541_s6, 16 }
 0x2f7   :  { %p364_p5 = scmp.ne.s32.totalorder %s541_s6, %s363_s18  ;;  %p367_p6 = scmp.lt.u32.totalorder %s363_s18, %s541_s6 }
 0x2f9   :  { %p369_p7 = pnand %p367_p6, %p364_p5 }
 0x2fb   :  { %372 = shalt.err (!%p369_p7)
}
 0x2fc   :  { %234 = dma.vmem_to_hbm [thread:$0]  %s232_s5, 16, %s541_s6, [#allocation3]   ;;  %vm223_vm5 = vcmask 0  }
 0x2fd   :  { %s403_s25 = smov [#allocation4]  }
 0x2fe   :  { %s241_s26 = sshll.u32 %s403_s25, 4  ;;  %s242_s26 = int_to_ptr.vmem [resolvable:$true] %s241_s26 }
 0x2ff   :  { %s373_s27 = scalar_lea.vmem %s242_s26, 16  ;;  %s377_s28 = scalar_lea.vmem %s242_s26, 32 }
 0x300   :  { %p374_p8 = scmp.ne.s32.totalorder %s242_s26, %s373_s27  ;;  %p378_p9 = scmp.lt.s32.totalorder %s242_s26, %s242_s26 }
 0x301   :  { %p379_p10 = scmp.lt.s32.totalorder %s377_s28, %s373_s27 }
 0x303   :  { %p380_p11 = por %p379_p10, %p378_p9 }
 0x305   :  { %p381_p12 = pnand %p380_p11, %p374_p8 }
 0x381   :  { %v222_v57 = vpop.xlane.xlu1 %221 }
 0x382   :  { %224 = vst.msk [vmem:[#allocation4] sm:$0x1] %vm223_vm5, %v222_v57 }
 0x383   :  { %384 = shalt.err (!%p381_p12)
}
 0x384   :  { %s385_s8 = scalar_lea.hbm %s542_s7, 16 }
 0x385   :  { %p386_p13 = scmp.ne.s32.totalorder %s542_s7, %s385_s8  ;;  %p389_p0 = scmp.lt.u32.totalorder %s385_s8, %s542_s7 }
 0x387   :  { %p391_p1 = pnand %p389_p0, %p386_p13 }
 0x389   :  { %394 = shalt.err (!%p391_p1)
}
 0x38a   :  { %244 = dma.vmem_to_hbm [thread:$0]  %s242_s26, 16, %s542_s7, [#allocation5]  }
 0x38b   :  { %395 = dma.done.wait [#allocation3], 16  }
 0x38c   :  { %396 = vsyncadd [#allocation3], 4294967280 }
 0x38d   :  { %397 = dma.done.wait [#allocation5], 16  }
 0x38e   :  { %398 = vsyncadd [#allocation5], 4294967280 }
 0x38f   :  { %251 = vsyncpa [#allocation3], 1 }
 0x390   :  { %252 = vsyncpa [#allocation5], 1 }

</bundles_post_ra>
